<compile_context>
chip_gen: v5e
topology: v5e:2x2
jax: 0.10.0
libtpu: 0.0.40
codegen_flags: <defaults>
</compile_context>

<pallas_src>
import functools

import jax
import jax.numpy as jnp
from jax import lax
from jax.experimental import pallas as pl
from jax.experimental.pallas import tpu as pltpu


_VMEM = functools.partial(pl.BlockSpec, memory_space=pltpu.MemorySpace.VMEM)


# ----------------------------------------------------------------------------
# Tiled matmul-with-bias kernel (hoisted input projection, folded biases)
# ----------------------------------------------------------------------------
def _matmul_bias_kernel(x_ref, w_ref, b_ref, o_ref, acc_ref):
    @pl.when(pl.program_id(2) == 0)
    def _():
        acc_ref[...] = jnp.zeros_like(acc_ref)

    acc_ref[...] += jnp.dot(x_ref[...], w_ref[...],
                            preferred_element_type=jnp.float32)

    @pl.when(pl.program_id(2) == pl.num_programs(2) - 1)
    def _():
        o_ref[...] = (acc_ref[...] + b_ref[...]).astype(o_ref.dtype)


def matmul_bias(x, w, b, tm=256, tn=256, tk=512):
    """x: (M,K), w: (K,N), b: (1,N) -> (M,N) f32; MXU-tiled when divisible."""
    M, K = x.shape
    N = w.shape[1]
    tm = tm if M % tm == 0 else M      # fall back to a single block on small dims
    tn = tn if N % tn == 0 else N
    tk = tk if K % tk == 0 else K
    return pl.pallas_call(
        _matmul_bias_kernel,
        grid=(M // tm, N // tn, K // tk),
        in_specs=[
            pl.BlockSpec((tm, tk), lambda i, j, k: (i, k)),
            pl.BlockSpec((tk, tn), lambda i, j, k: (k, j)),
            pl.BlockSpec((1, tn), lambda i, j, k: (0, j)),
        ],
        out_specs=pl.BlockSpec((tm, tn), lambda i, j, k: (i, j)),
        out_shape=jax.ShapeDtypeStruct((M, N), jnp.float32),
        scratch_shapes=[pltpu.VMEM((tm, tn), jnp.float32)],
        compiler_params=pltpu.CompilerParams(
            dimension_semantics=("parallel", "parallel", "arbitrary")),
    )(x, w, b)


# ----------------------------------------------------------------------------
# Fused bidirectional LSTM recurrence (whole sequence resident in VMEM)
# ----------------------------------------------------------------------------
def _bilstm_recurrence(gx_ref, lens_ref, whh_ref, h_sc, c_sc, hseq_ref, T, H):
    """gx_ref: (T,B,8H) precomputed x@Wih+b (interleaved fwd/bwd gate cols),
    lens_ref: (B,1) int32, whh_ref: (2H,8H) block-diagonal recurrent weight."""
    H2 = 2 * H
    h_sc[...] = jnp.zeros_like(h_sc)
    c_sc[...] = jnp.zeros_like(c_sc)

    whh = whh_ref[...]                                  # (2H, 8H), hoisted
    lens = lens_ref[...]                                # (B, 1) int32
    # gate columns: [i_f i_b f_f f_b g_f g_b o_f o_b]; even H-groups = fwd
    col8 = lax.broadcasted_iota(jnp.int32, (1, 8 * H), 1)
    is_fwd8 = (col8 // H) % 2 == 0
    col2 = lax.broadcasted_iota(jnp.int32, (1, H2), 1)
    is_fwd2 = col2 < H                                  # state layout [h_f|h_b]

    def step(s, carry):
        tf = s                      # forward-direction time index
        tb = T - 1 - s              # backward-direction time index
        h = h_sc[...]
        c = c_sc[...]
        # per-direction precomputed input projections, selected per column
        gx_t = jnp.where(is_fwd8, gx_ref[tf], gx_ref[tb])            # (B, 8H)
        gates = gx_t + jnp.dot(h, whh, preferred_element_type=jnp.float32)
        i = jax.nn.sigmoid(gates[:, 0 * H2:1 * H2])
        f = jax.nn.sigmoid(gates[:, 1 * H2:2 * H2])
        g = jnp.tanh(gates[:, 2 * H2:3 * H2])
        o = jax.nn.sigmoid(gates[:, 3 * H2:4 * H2])
        c_new = f * c + i * g
        h_new = o * jnp.tanh(c_new)
        # packed-sequence semantics: state only advances on valid timesteps
        m_f = (lens > tf).astype(jnp.float32)                        # (B, 1)
        m_b = (lens > tb).astype(jnp.float32)                        # (B, 1)
        m = jnp.where(is_fwd2, m_f, m_b)                             # (B, 2H)
        c_upd = m * c_new + (1.0 - m) * c
        h_upd = m * h_new + (1.0 - m) * h
        c_sc[...] = c_upd
        h_sc[...] = h_upd
        if hseq_ref is not None:
            # pad_packed_sequence pads invalid positions with zeros
            hseq_ref[tf, :, 0:H] = h_upd[:, 0:H] * m_f
            hseq_ref[tb, :, H:H2] = h_upd[:, H:H2] * m_b
        return carry

    if T <= 16:
        # short sequence: full static unroll (LLO scheduler visibility)
        for s in range(T):
            step(s, 0)
    else:
        lax.fori_loop(0, T, step, 0)


def _bilstm_seq_kernel(gx_ref, lens_ref, whh_ref, hseq_ref, h_sc, c_sc, *, T, H):
    _bilstm_recurrence(gx_ref, lens_ref, whh_ref, h_sc, c_sc, hseq_ref, T, H)


def _bilstm_fc_kernel(gx_ref, lens_ref, whh_ref, fcw_ref, fcb_ref, res_ref,
                      h_sc, c_sc, *, T, H):
    _bilstm_recurrence(gx_ref, lens_ref, whh_ref, h_sc, c_sc, None, T, H)
    # last-layer epilogue: hidden = [h_fwd_last | h_bwd_last] is already in
    # VMEM scratch -> fuse the nn.Linear head here (no HBM roundtrip, no
    # separate pallas_call, no concatenate).
    res_ref[...] = (jnp.dot(h_sc[...], fcw_ref[...],
                            preferred_element_type=jnp.float32) + fcb_ref[...])


def bilstm_layer(gx, lens, whh_bd):
    """Intermediate bi-LSTM layer: returns the (T, B, 2H) hidden sequence."""
    T, B, H8 = gx.shape
    H = H8 // 8
    return pl.pallas_call(
        functools.partial(_bilstm_seq_kernel, T=T, H=H),
        in_specs=[_VMEM(), _VMEM(), _VMEM()],
        out_specs=_VMEM(),
        out_shape=jax.ShapeDtypeStruct((T, B, 2 * H), jnp.float32),
        scratch_shapes=[pltpu.VMEM((B, 2 * H), jnp.float32),
                        pltpu.VMEM((B, 2 * H), jnp.float32)],
    )(gx, lens, whh_bd)


def bilstm_layer_with_fc(gx, lens, whh_bd, fc_w, fc_b):
    """Last bi-LSTM layer fused with the classifier head: returns (B, OUT)."""
    T, B, H8 = gx.shape
    H = H8 // 8
    out_dim = fc_w.shape[1]
    return pl.pallas_call(
        functools.partial(_bilstm_fc_kernel, T=T, H=H),
        in_specs=[_VMEM()] * 5,
        out_specs=_VMEM(),
        out_shape=jax.ShapeDtypeStruct((B, out_dim), jnp.float32),
        scratch_shapes=[pltpu.VMEM((B, 2 * H), jnp.float32),
                        pltpu.VMEM((B, 2 * H), jnp.float32)],
    )(gx, lens, whh_bd, fc_w, fc_b)


# ----------------------------------------------------------------------------
# One-time weight rearrangement (PyTorch [i f g o] per direction -> fused)
# ----------------------------------------------------------------------------
def _interleave_gate_cols(a_f, a_b, H):
    """[..., 4H] fwd/bwd -> [..., 8H] as [i_f i_b f_f f_b g_f g_b o_f o_b]."""
    lead = a_f.shape[:-1]
    gf = a_f.reshape(lead + (4, H))
    gb = a_b.reshape(lead + (4, H))
    return jnp.stack([gf, gb], axis=-2).reshape(lead + (8 * H,))


def _prepare_layer_weights(layer_p, H):
    wih_f, whh_f, b_f = layer_p["fwd"]
    wih_b, whh_b, b_b = layer_p["bwd"]
    wih_cat = _interleave_gate_cols(wih_f, wih_b, H)            # (Din, 8H)
    b_cat = _interleave_gate_cols(b_f, b_b, H)                  # (1, 8H)
    # block-diagonal recurrent weight: rows [0:H] act on h_fwd, rows [H:2H]
    # on h_bwd -> one (B,2H)x(2H,8H) MXU matmul per step for both directions
    zf = jnp.zeros_like(whh_f)
    whh_bd = jnp.concatenate(
        [_interleave_gate_cols(whh_f, zf, H),
         _interleave_gate_cols(zf, whh_b, H)], axis=0)          # (2H, 8H)
    return wih_cat, whh_bd, b_cat


# ----------------------------------------------------------------------------
# Model (bidirectional multi-layer LSTM classifier)
# ----------------------------------------------------------------------------
def init_params(key, vocab_size, embedding_dim, hidden_dim, output_dim,
                n_layers, pad_idx):
    keys = jax.random.split(key, 64)
    ki = iter(range(64))
    emb = jax.random.normal(keys[next(ki)], (vocab_size, embedding_dim),
                            jnp.float32)
    emb = emb.at[pad_idx].set(0.0)   # padding_idx row is zero

    k = 1.0 / jnp.sqrt(hidden_dim)
    lstm = []
    for layer in range(n_layers):
        din = embedding_dim if layer == 0 else 2 * hidden_dim
        dirs = {}
        for d in ("fwd", "bwd"):
            wih = jax.random.uniform(keys[next(ki)], (din, 4 * hidden_dim),
                                     jnp.float32, -k, k)
            whh = jax.random.uniform(keys[next(ki)], (hidden_dim, 4 * hidden_dim),
                                     jnp.float32, -k, k)
            # NOTE: PyTorch carries b_ih and b_hh; they are pre-summed here.
            b = jax.random.uniform(keys[next(ki)], (1, 4 * hidden_dim),
                                   jnp.float32, -k, k)
            dirs[d] = (wih, whh, b)
        lstm.append(dirs)

    kf = 1.0 / jnp.sqrt(2 * hidden_dim)
    fc_w = jax.random.uniform(keys[next(ki)], (2 * hidden_dim, output_dim),
                              jnp.float32, -kf, kf)
    fc_b = jax.random.uniform(keys[next(ki)], (1, output_dim),
                              jnp.float32, -kf, kf)
    return {"embedding": emb, "lstm": lstm, "fc_w": fc_w, "fc_b": fc_b}


def rnn_forward(params, text, text_lengths):
    """text: (T,B) int32, text_lengths: (B,) int32 -> (B, output_dim)."""
    T, B = text.shape
    H = params["lstm"][0]["fwd"][1].shape[0]
    # embedding gather + (identity) dropout in plain JAX
    x = params["embedding"][text]                               # (T, B, E)
    lens = text_lengths.astype(jnp.int32).reshape(B, 1)

    n_layers = len(params["lstm"])
    res = None
    for li, layer_p in enumerate(params["lstm"]):
        wih_cat, whh_bd, b_cat = _prepare_layer_weights(layer_p, H)
        din = x.shape[-1]
        # hoisted input projection for both directions: one big MXU matmul
        gx = matmul_bias(x.reshape(T * B, din), wih_cat, b_cat)
        gx = gx.reshape(T, B, 8 * H)
        if li == n_layers - 1:
            res = bilstm_layer_with_fc(gx, lens, whh_bd,
                                       params["fc_w"], params["fc_b"])
        else:
            x = bilstm_layer(gx, lens, whh_bd)
    return res


# ----------------------------------------------------------------------------
# Pure-JAX reference (PyTorch-layout weights; validates the rearrangement)
# ----------------------------------------------------------------------------
def _lstm_layer_ref(x_seq, mask, wih, whh, b):
    B = x_seq.shape[1]
    H = whh.shape[0]
    mm = functools.partial(jnp.matmul, precision=lax.Precision.HIGHEST)

    def step(carry, inp):
        h, c = carry
        x, m = inp
        gates = mm(x, wih) + mm(h, whh) + b[0]
        i = jax.nn.sigmoid(gates[:, 0 * H:1 * H])
        f = jax.nn.sigmoid(gates[:, 1 * H:2 * H])
        g = jnp.tanh(gates[:, 2 * H:3 * H])
        o = jax.nn.sigmoid(gates[:, 3 * H:4 * H])
        c_new = f * c + i * g
        h_new = o * jnp.tanh(c_new)
        c = m * c_new + (1.0 - m) * c
        h = m * h_new + (1.0 - m) * h
        return (h, c), h * m

    init = (jnp.zeros((B, H), jnp.float32), jnp.zeros((B, H), jnp.float32))
    (h, _), hseq = lax.scan(step, init, (x_seq, mask))
    return hseq, h


def rnn_forward_ref(params, text, text_lengths):
    T, B = text.shape
    embedded = params["embedding"][text]
    mask = (jnp.arange(T)[:, None] < text_lengths[None, :]).astype(
        jnp.float32)[..., None]
    x = embedded
    hlast_f = hlast_b = None
    for layer_p in params["lstm"]:
        hseq_f, hlast_f = _lstm_layer_ref(x, mask, *layer_p["fwd"])
        hseq_b_rev, hlast_b = _lstm_layer_ref(x[::-1], mask[::-1],
                                              *layer_p["bwd"])
        x = jnp.concatenate([hseq_f, hseq_b_rev[::-1]], axis=-1)
    hidden = jnp.concatenate([hlast_f, hlast_b], axis=1)
    return jnp.matmul(hidden, params["fc_w"],
                      precision=lax.Precision.HIGHEST) + params["fc_b"]


# ----------------------------------------------------------------------------
if __name__ == "__main__":
    VOCAB, EMB, HID, OUT = 50, 32, 32, 2
    N_LAYERS, PAD_IDX = 2, 1
    T, B = 8, 4

    key = jax.random.PRNGKey(0)
    kp, kt = jax.random.split(key)
    params = init_params(kp, VOCAB, EMB, HID, OUT, N_LAYERS, PAD_IDX)

    text = jax.random.randint(kt, (T, B), 0, VOCAB, dtype=jnp.int32)
    text_lengths = jnp.array([8, 6, 5, 3], dtype=jnp.int32)  # sorted desc
    # zero out padded positions of text with pad_idx (like a padded batch)
    pad_mask = jnp.arange(T)[:, None] < text_lengths[None, :]
    text = jnp.where(pad_mask, text, PAD_IDX)

    out = rnn_forward(params, text, text_lengths)
    jax.block_until_ready(out)

    ref = rnn_forward_ref(params, text, text_lengths)
    assert out.shape == (B, OUT)
    assert jnp.max(jnp.abs(out - ref)) < 1e-2, (
        f"mismatch: {jnp.max(jnp.abs(out - ref))}")

    print("KERNEL_OK")
</pallas_src>

<mosaic_0001>
module attributes {stable_mosaic.version = 11 : i64} {
  func.func @_matmul_bias_kernel(%arg0: i32, %arg1: i32, %arg2: i32, %arg3: memref<32x32xf32, #tpu.memory_space<vmem>>, %arg4: memref<32x256xf32, #tpu.memory_space<vmem>>, %arg5: memref<1x256xf32, #tpu.memory_space<vmem>>, %arg6: memref<32x256xf32, #tpu.memory_space<vmem>>, %arg7: memref<32x256xf32, #tpu.memory_space<vmem>>) attributes {dimension_semantics = [#tpu.dimension_semantics<parallel>, #tpu.dimension_semantics<parallel>, #tpu.dimension_semantics<arbitrary>], iteration_bounds = array<i64: 1, 1, 1>, scalar_prefetch = 0 : i64, scratch_operands = 1 : i64, tpu.core_type = #tpu.core_type<tc>, window_params = [{transform_indices = @transform_0, window_bounds = array<i64: 32, 32>}, {transform_indices = @transform_1, window_bounds = array<i64: 32, 256>}, {transform_indices = @transform_2, window_bounds = array<i64: 1, 256>}, {transform_indices = @transform_3, window_bounds = array<i64: 32, 256>}]} {
    %c0_i32 = arith.constant 0 : i32
    %0 = arith.cmpi eq, %arg2, %c0_i32 : i32
    %1 = arith.extui %0 : i1 to i32
    %c0_i32_0 = arith.constant 0 : i32
    %2 = arith.cmpi ne, %1, %c0_i32_0 : i32
    scf.if %2 {
      %cst_10 = arith.constant 0.000000e+00 : f32
      %12 = vector.broadcast %cst_10 : f32 to vector<32x256xf32>
      %c0_11 = arith.constant 0 : index
      %c0_12 = arith.constant 0 : index
      %13 = vector.load %arg7[%c0_11, %c0_12] : memref<32x256xf32, #tpu.memory_space<vmem>>, vector<32x256xf32>
      tpu.vector_store %arg7[%c0_11, %c0_12], %12 {strides = array<i32>} : memref<32x256xf32, #tpu.memory_space<vmem>>, vector<32x256xf32>,
    } else {
    }
    %c0 = arith.constant 0 : index
    %c0_1 = arith.constant 0 : index
    %3 = vector.load %arg7[%c0, %c0_1] : memref<32x256xf32, #tpu.memory_space<vmem>>, vector<32x256xf32>
    %c0_2 = arith.constant 0 : index
    %c0_3 = arith.constant 0 : index
    %4 = vector.load %arg3[%c0_2, %c0_3] : memref<32x32xf32, #tpu.memory_space<vmem>>, vector<32x32xf32>
    %c0_4 = arith.constant 0 : index
    %c0_5 = arith.constant 0 : index
    %5 = vector.load %arg4[%c0_4, %c0_5] : memref<32x256xf32, #tpu.memory_space<vmem>>, vector<32x256xf32>
    %cst = arith.constant dense<0.000000e+00> : vector<32x256xf32>
    %6 = tpu.matmul %4, %5, %cst {dimension_numbers = #tpu.dot_dimension_numbers<[1], [0], [0], [1], [0, 0, 1, 1], [], []>} : vector<32x32xf32>, vector<32x256xf32>, vector<32x256xf32> -> vector<32x256xf32>
    %7 = arith.addf %3, %6 : vector<32x256xf32>
    %c0_6 = arith.constant 0 : index
    %c0_7 = arith.constant 0 : index
    %8 = vector.load %arg7[%c0_6, %c0_7] : memref<32x256xf32, #tpu.memory_space<vmem>>, vector<32x256xf32>
    tpu.vector_store %arg7[%c0_6, %c0_7], %7 {strides = array<i32>} : memref<32x256xf32, #tpu.memory_space<vmem>>, vector<32x256xf32>,
    %c0_i32_8 = arith.constant 0 : i32
    %9 = arith.cmpi eq, %arg2, %c0_i32_8 : i32
    %10 = arith.extui %9 : i1 to i32
    %c0_i32_9 = arith.constant 0 : i32
    %11 = arith.cmpi ne, %10, %c0_i32_9 : i32
    scf.if %11 {
      %c0_10 = arith.constant 0 : index
      %c0_11 = arith.constant 0 : index
      %12 = vector.load %arg7[%c0_10, %c0_11] : memref<32x256xf32, #tpu.memory_space<vmem>>, vector<32x256xf32>
      %c0_12 = arith.constant 0 : index
      %c0_13 = arith.constant 0 : index
      %13 = vector.load %arg5[%c0_12, %c0_13] : memref<1x256xf32, #tpu.memory_space<vmem>>, vector<1x256xf32>
      %14 = vector.broadcast %13 : vector<1x256xf32> to vector<32x256xf32>
      %15 = arith.addf %12, %14 : vector<32x256xf32>
      %c0_14 = arith.constant 0 : index
      %c0_15 = arith.constant 0 : index
      %16 = vector.load %arg6[%c0_14, %c0_15] : memref<32x256xf32, #tpu.memory_space<vmem>>, vector<32x256xf32>
      tpu.vector_store %arg6[%c0_14, %c0_15], %15 {strides = array<i32>} : memref<32x256xf32, #tpu.memory_space<vmem>>, vector<32x256xf32>,
    } else {
    }
    return
  }
  func.func @transform_0(%arg0: i32, %arg1: i32, %arg2: i32) -> (i32, i32) {
    %c0_i32 = arith.constant 0 : i32
    return %arg0, %arg2 : i32, i32
  }
  func.func @transform_1(%arg0: i32, %arg1: i32, %arg2: i32) -> (i32, i32) {
    %c0_i32 = arith.constant 0 : i32
    return %arg2, %arg1 : i32, i32
  }
  func.func @transform_2(%arg0: i32, %arg1: i32, %arg2: i32) -> (i32, i32) {
    %c0_i32 = arith.constant 0 : i32
    %c0_i32_0 = arith.constant 0 : i32
    return %c0_i32, %arg1 : i32, i32
  }
  func.func @transform_3(%arg0: i32, %arg1: i32, %arg2: i32) -> (i32, i32) {
    %c0_i32 = arith.constant 0 : i32
    return %arg0, %arg1 : i32, i32
  }
}

</mosaic_0001>

<bundles_post_ra>
// kernel: tpu_custom_call.1
= control target key start
LH: loop header
LB: loop body
LE: loop exit
PB: predicated region body
PF: predicated region fallthrough
CT: control target
= control target key end

     0   :  { %8 = vsyncpa [#allocation4], 0  ;;  %s412_s0 = inlined_call_operand.hbm [shape: f32[32,32], index: 0, kind: input, shape index: {}]   ;;  %s413_s1 = inlined_call_operand.hbm [shape: f32[32,256], index: 1, kind: input, shape index: {}]   ;;  %s414_s2 = inlined_call_operand.hbm [shape: f32[1,256], index: 2, kind: input, shape index: {}]   ;;  %s415_s3 = inlined_call_operand.hbm [shape: f32[32,256], index: 3, kind: output, shape index: {}]  }
   0x1   :  { %9 = vsyncpa [#allocation7], 0  ;;  %s28_s14 = sshll.u32 %s413_s1, 4  ;;  %s29_s14 = int_to_ptr.hbm [resolvable:$true] %s28_s14 }
   0x2   :  { %10 = vsyncpa [#allocation5], 0  ;;  %s358_s15 = smov [#allocation6]   ;;  %s15_s19 = sshll.u32 %s412_s0, 4  ;;  %s16_s19 = int_to_ptr.hbm [resolvable:$true] %s15_s19 }
   0x3   :  { %s30_s16 = sshll.u32 %s358_s15, 4  ;;  %s359_s20 = smov 256   ;;  %s31_s16 = int_to_ptr.vmem [resolvable:$true] %s30_s16 }
   0x4   :  { %s360_s21 = smov 16   ;;  %s361_s22 = smov [#allocation3]  }
   0x5   :  { %36 = dma.hbm_to_vmem [thread:$0]  %s29_s14, 1024, %s31_s16, [#allocation7], %s359_s20, %s359_s20, %s360_s21  }
   0x6   :  { %s17_s23 = sshll.u32 %s361_s22, 4  ;;  %s362_s1 = smov 128   ;;  %s18_s23 = int_to_ptr.vmem [resolvable:$true] %s17_s23 }
   0x7   :  { %s363_s24 = smov 8   ;;  %s42_s27 = sshll.u32 %s414_s2, 4  ;;  %s43_s27 = int_to_ptr.hbm [resolvable:$true] %s42_s27 }
   0x8   :  { %23 = dma.hbm_to_vmem [thread:$0]  %s16_s19, 512, %s18_s23, [#allocation4], %s362_s1, %s362_s1, %s363_s24  }
   0x9   :  { %s364_s28 = smov [#allocation8]  }
   0xa   :  { %s44_s0 = sshll.u32 %s364_s28, 4  ;;  %s45_s0 = int_to_ptr.vmem [resolvable:$true] %s44_s0 }
   0xb   :  { %47 = dma.hbm_to_vmem [thread:$0]  %s43_s27, 32, %s45_s0, [#allocation7]  }
   0xc   :  { %352 = dma.done.wait [#allocation4], 512  }
   0xd   :  { %353 = vsyncadd [#allocation4], 4294966784 }
   0xe   :  { %354 = dma.done.wait [#allocation7], 1056  }
   0xf   :  { %355 = vsyncadd [#allocation7], 4294966240  ;;  %v90_v0 = vld [vmem:[#allocation6 + $0x30] sm:$0xff]  ;;  %v91_v1 = vld [vmem:[#allocation6 + $0x38] sm:$0xff]  ;;  %vm92_vm0 = vcmask 261120   ;;  %s365_s2 = smov [#allocation9]  }
  0x10   :  { %v88_v2 = vld [vmem:[#allocation6 + $0x20] sm:$0xff]  ;;  %240 = vmatpush.msra.mxu2 %v90_v0  ;;  %244 = vmatpush.msra.mxu3 %v91_v1  ;;  %v89_v3 = vld [vmem:[#allocation6 + $0x28] sm:$0xff]  ;;  %v86_v4 = vld [vmem:[#allocation6 + $0x10] sm:$0xff]  ;;  %s216_s29 = sshll.u32 %s365_s2, 4  ;;  %s218_s5 = sshll.u32 %s415_s3, 4  ;;  %s217_s29 = int_to_ptr.vmem [resolvable:$true] %s216_s29  ;;  %s219_s5 = int_to_ptr.hbm [resolvable:$true] %s218_s5 }
  0x11   :  { %v87_v5 = vld [vmem:[#allocation6 + $0x18] sm:$0xff]  ;;  %117 = vmatpush.msra.mxu0 %v90_v0  ;;  %146 = vmatpush.msra.mxu1 %v91_v1  ;;  %v84_v6 = vld [vmem:[#allocation6] sm:$0xff]  ;;  %v85_v7 = vld [vmem:[#allocation6 + $0x8] sm:$0xff] }
  0x12   :  { %241 = vmatpush.msra.mxu2 %v88_v2  ;;  %245 = vmatpush.msra.mxu3 %v89_v3  ;;  %v82_v8 = vld [vmem:[#allocation3 + $0x10] sm:$0xff]  ;;  %v80_v9 = vld [vmem:[#allocation3] sm:$0xff]  ;;  %v83_v10 = vld [vmem:[#allocation3 + $0x18] sm:$0xff] }
  0x13   :  { %118 = vmatpush.msra.mxu0 %v88_v2  ;;  %147 = vmatpush.msra.mxu1 %v89_v3  ;;  %v81_v11 = vld [vmem:[#allocation3 + $0x8] sm:$0xff]  ;;  %v190_v12 = vld [vmem:[#allocation8] sm:$0x3] }
  0x14   :  { %242 = vmatpush.msra.mxu2 %v86_v4  ;;  %246 = vmatpush.msra.mxu3 %v87_v5  ;;  %v192_v13 = vperm.slane %v190_v12, 0  ;;  %v193_v14 = vperm.slane %v190_v12, 1 }
  0x15   :  { %119 = vmatpush.msra.mxu0 %v86_v4  ;;  %148 = vmatpush.msra.mxu1 %v87_v5 }
  0x16   :  { %243 = vmatpush.msra.mxu2 %v84_v6  ;;  %247 = vmatpush.msra.mxu3 %v85_v7 }
  0x17   :  { %234 = vmatmul.msk.f32.vlgmr.msra.gmra.mxu2 %vm92_vm0, %v82_v8  ;;  %238 = vmatmul.msk.f32.vlgmr.msra.gmra.mxu3 %vm92_vm0, %v82_v8 }
  0x18   :  { %120 = vmatpush.msra.mxu0 %v84_v6  ;;  %149 = vmatpush.msra.mxu1 %v85_v7 }
  0x19   :  { %232 = vmatmul.msk.f32.vlgmr.msra.gmra.mxu0 %vm92_vm0, %v80_v9  ;;  %236 = vmatmul.msk.f32.vlgmr.msra.gmra.mxu1 %vm92_vm0, %v80_v9 }
  0x1f   :  { %235 = vmatmul.msk.f32.gmra.mxu2 %vm92_vm0, %v83_v10  ;;  %239 = vmatmul.msk.f32.gmra.mxu3 %vm92_vm0, %v83_v10 }
  0x21   :  { %233 = vmatmul.msk.f32.gmra.mxu0 %vm92_vm0, %v81_v11  ;;  %237 = vmatmul.msk.f32.gmra.mxu1 %vm92_vm0, %v81_v11 }
  0x96   :  { %v122_v15 = vpop.f32.mrf.mxu0  ;;  %v151_v16 = vpop.f32.mrf.mxu1 }
  0x97   :  { %v196_v17 = vadd.f32 %v192_v13, %v122_v15  ;;  %v197_v18 = vadd.f32 %v193_v14, %v151_v16 }
  0x99   :  { %204 = vst [vmem:[#allocation9] sm:$0xff] %v196_v17 }
  0x9a   :  { %v128_v19 = vpop.f32.mrf.mxu2  ;;  %205 = vst [vmem:[#allocation9 + $0x8] sm:$0xff] %v197_v18  ;;  %v157_v20 = vpop.f32.mrf.mxu3 }
  0x9b   :  { %v200_v21 = vadd.f32 %v192_v13, %v128_v19  ;;  %v201_v22 = vadd.f32 %v193_v14, %v157_v20 }
  0x9d   :  { %208 = vst [vmem:[#allocation9 + $0x20] sm:$0xff] %v200_v21 }
  0x9e   :  { %209 = vst [vmem:[#allocation9 + $0x28] sm:$0xff] %v201_v22  ;;  %v125_v23 = vpop.f32.mrf.mxu0  ;;  %v154_v24 = vpop.f32.mrf.mxu1 }
  0x9f   :  { %v198_v25 = vadd.f32 %v192_v13, %v125_v23  ;;  %v199_v26 = vadd.f32 %v193_v14, %v154_v24 }
  0xa1   :  { %206 = vst [vmem:[#allocation9 + $0x10] sm:$0xff] %v198_v25 }
  0xa2   :  { %v131_v27 = vpop.f32.mrf.mxu2  ;;  %207 = vst [vmem:[#allocation9 + $0x18] sm:$0xff] %v199_v26  ;;  %v160_v28 = vpop.f32.mrf.mxu3 }
  0xa3   :  { %v202_v29 = vadd.f32 %v192_v13, %v131_v27  ;;  %v203_v30 = vadd.f32 %v193_v14, %v160_v28 }
  0xa5   :  { %210 = vst [vmem:[#allocation9 + $0x30] sm:$0xff] %v202_v29 }
  0xa6   :  { %211 = vst [vmem:[#allocation9 + $0x38] sm:$0xff] %v203_v30 }
  0xa7   :  { %224 = dma.vmem_to_hbm [thread:$0]  %s217_s29, 1024, %s219_s5, [#allocation5], %s359_s20, %s359_s20, %s360_s21  }
  0xa8   :  { %356 = dma.done.wait [#allocation5], 1024  }
  0xa9   :  { %357 = vsyncadd [#allocation5], 4294966272 }
  0xaa   :  { %229 = vsyncpa [#allocation4], 1 }
  0xab   :  { %230 = vsyncpa [#allocation7], 1 }
  0xac   :  { %231 = vsyncpa [#allocation5], 1 }

</bundles_post_ra>
